<compile_context>
chip_gen: v6e
topology: v6e:2x2x1
jax: 0.10.0
libtpu: 0.0.40
codegen_flags: <defaults>
</compile_context>

<pallas_src>
import functools

import jax
import jax.numpy as jnp
from jax.experimental import pallas as pl
from jax.experimental.pallas import tpu as pltpu


def _linear_attention_kernel(nq, emb_dim, eps, x_ref, w_ref, out_ref):
    E = emb_dim

    # Packed parameter slab (see pack_params), shape [E+8, 3E]:
    #   rows 0..E-1 : [ wq_t*scale | wk_t | wv_t ]
    #   row  E      : [ bq*scale   | bv   | gamma ]
    #   row  E+1    : [ beta       | 0    | 0     ]
    w = w_ref[:E, :]                    # [E, 3E]
    bq = w_ref[E:E + 1, :E]             # [1, E]
    bv = w_ref[E:E + 1, E:2 * E]        # [1, E]
    gamma = w_ref[E:E + 1, 2 * E:]      # [1, E]
    beta = w_ref[E + 1:E + 2, :E]       # [1, E]

    # --- one fused MXU matmul for all three projections over both row groups -
    res = jnp.dot(x_ref[...], w, preferred_element_type=jnp.float32)  # [Nq+Nk, 3E]
    q_logits = res[:nq, :E] + bq        # scale already folded into wq/bq
    k_logits = res[nq:, E:2 * E]        # bk dropped: column softmax is invariant
    v = res[nq:, 2 * E:]                # bv folded into context below (exact)

    # --- q: UNnormalized row softmax; 1/s is folded into LayerNorm below -----
    p = jnp.exp(q_logits - jnp.max(q_logits, axis=-1, keepdims=True))  # [Nq, E]
    s = jnp.sum(p, axis=-1, keepdims=True)                             # [Nq, 1]

    # --- k: softmax over the token dim (dim=0) --------------------------------
    k = jnp.exp(k_logits - jnp.max(k_logits, axis=0, keepdims=True))
    k = k * pl.reciprocal(jnp.sum(k, axis=0, keepdims=True), approx=False)

    # --- context = einsum('be,be->e', k, v) ; bv folds exactly (sum k == 1) ---
    context = jnp.sum(k * v, axis=0, keepdims=True) + bv               # [1, E]

    # --- LayerNorm of (p/s)*context, computed on u = p*context with eps*s^2 ---
    # (u - mean(u)) / sqrt(var(u) + eps*s^2) == LayerNorm_eps((u/s)) exactly.
    u = p * context                                                    # [Nq, E]
    mean = jnp.mean(u, axis=-1, keepdims=True)
    c = u - mean
    var = jnp.mean(c * c, axis=-1, keepdims=True)
    out = c * jax.lax.rsqrt(var + eps * (s * s))
    out_ref[...] = (out * gamma + beta).astype(out_ref.dtype)


def linear_attention(query, key_value, packed, *, emb_dim, eps=1e-5):
    """query: [Nq, E] f32, key_value: [Nk, E] f32 -> [Nq, E] f32."""
    nq, e = query.shape
    assert e == emb_dim and key_value.shape[1] == emb_dim

    # Stack the two activation slabs so the kernel does a single fused matmul
    # and carries only 2 input DMAs (activations + packed params).
    x = jnp.concatenate([query, key_value], axis=0)   # [Nq+Nk, E]

    kernel = functools.partial(_linear_attention_kernel, nq, emb_dim, eps)

    # Small operands: everything fully VMEM-resident, single grid point.
    vmem_spec = pl.BlockSpec(memory_space=pltpu.MemorySpace.VMEM)
    return pl.pallas_call(
        kernel,
        out_shape=jax.ShapeDtypeStruct((nq, emb_dim), jnp.float32),
        in_specs=[vmem_spec, vmem_spec],
        out_specs=vmem_spec,
    )(x, packed["w_all"])


def init_params(key, emb_dim):
    """Deterministic synthetic weights matching nn.Linear / nn.LayerNorm shapes.

    nn.Linear stores W as [out, in]; we keep the pre-transposed [in, out] form
    so the kernel does x @ W_T. Biases / LayerNorm params are kept 2D [1, E].
    """
    ks = jax.random.split(key, 6)
    lim = 1.0 / jnp.sqrt(emb_dim)

    def uni(k, shape):
        return jax.random.uniform(k, shape, jnp.float32, minval=-lim, maxval=lim)

    return {
        "wq_t": uni(ks[0], (emb_dim, emb_dim)),   # already [in, out]
        "bq":   uni(ks[1], (1, emb_dim)),
        "wk_t": uni(ks[2], (emb_dim, emb_dim)),
        "bk":   uni(ks[3], (1, emb_dim)),          # dropped in kernel (exact no-op)
        "wv_t": uni(ks[4], (emb_dim, emb_dim)),
        "bv":   uni(ks[5], (1, emb_dim)),
        "gamma": jnp.ones((1, emb_dim), jnp.float32),
        "beta":  jnp.zeros((1, emb_dim), jnp.float32),
    }


def pack_params(params, emb_dim):
    """One-time packing of all weights/biases/LayerNorm params into ONE slab.

    Slab layout [E+8, 3E]:
      rows 0..E-1 : [ wq_t * scale | wk_t | wv_t ]
      row  E      : [ bq * scale   | bv   | gamma ]
      row  E+1    : [ beta         | 0    | 0     ]
      rows E+2..  : zero padding to an 8-sublane boundary.
    The attention scale E**-0.5 is folded into wq / bq; bk is dropped because
    softmax over axis=0 is invariant to per-column constants.
    """
    E = emb_dim
    scale = float(E) ** -0.5
    w = jnp.concatenate(
        [params["wq_t"] * scale, params["wk_t"], params["wv_t"]], axis=1)   # [E, 3E]
    row0 = jnp.concatenate(
        [params["bq"] * scale, params["bv"], params["gamma"]], axis=1)       # [1, 3E]
    row1 = jnp.concatenate(
        [params["beta"], jnp.zeros((1, 2 * E), jnp.float32)], axis=1)        # [1, 3E]
    pad = jnp.zeros((6, 3 * E), jnp.float32)
    w_all = jnp.concatenate([w, row0, row1, pad], axis=0)                    # [E+8, 3E]
    return {"w_all": w_all}


def _reference(query, key_value, params, emb_dim, eps=1e-5):
    """Pure-JAX reference of the PyTorch forward for sanity-checking."""
    scale = float(emb_dim) ** -0.5
    q = (query @ params["wq_t"] + params["bq"]) * scale
    k = key_value @ params["wk_t"] + params["bk"]
    v = key_value @ params["wv_t"] + params["bv"]
    q = jax.nn.softmax(q, axis=-1)
    k = jax.nn.softmax(k, axis=0)
    context = jnp.sum(k * v, axis=0)
    out = q * context[None, :]
    mean = out.mean(axis=-1, keepdims=True)
    var = ((out - mean) ** 2).mean(axis=-1, keepdims=True)
    out = (out - mean) / jnp.sqrt(var + eps)
    return out * params["gamma"] + params["beta"]


if __name__ == "__main__":
    # Small shapes consistent with the module's conventions:
    #   query:     [N*B, E]  with N=8, B=2   -> [16, 32]
    #   key_value: [HW*B, E] with H=W=4, B=2 -> [32, 32]
    emb_dim = 32
    nq, nk = 8 * 2, 4 * 4 * 2

    root = jax.random.PRNGKey(0)
    k_param, k_q, k_kv = jax.random.split(root, 3)

    params = init_params(k_param, emb_dim)
    packed = pack_params(params, emb_dim)          # one-time packing/pre-scaling
    query = jax.random.normal(k_q, (nq, emb_dim), jnp.float32)
    key_value = jax.random.normal(k_kv, (nk, emb_dim), jnp.float32)

    out = linear_attention(query, key_value, packed, emb_dim=emb_dim)
    out = jax.block_until_ready(out)

    ref = _reference(query, key_value, params, emb_dim)
    assert out.shape == (nq, emb_dim)
    assert jnp.allclose(out, ref, atol=2e-5, rtol=2e-5), "mismatch vs reference"

    print("KERNEL_OK")
</pallas_src>

<mosaic_0001>
module attributes {stable_mosaic.version = 11 : i64} {
  func.func @_linear_attention_kernel(%arg0: memref<48x32xf32, #tpu.memory_space<vmem>>, %arg1: memref<40x96xf32, #tpu.memory_space<vmem>>, %arg2: memref<16x32xf32, #tpu.memory_space<vmem>>) attributes {dimension_semantics = [], scalar_prefetch = 0 : i64, scratch_operands = 0 : i64, tpu.core_type = #tpu.core_type<tc>} {
    %c0 = arith.constant 0 : index
    %c0_0 = arith.constant 0 : index
    %0 = vector.load %arg1[%c0, %c0_0] : memref<40x96xf32, #tpu.memory_space<vmem>>, vector<32x96xf32>
    %c32 = arith.constant 32 : index
    %c0_1 = arith.constant 0 : index
    %1 = vector.load %arg1[%c32, %c0_1] : memref<40x96xf32, #tpu.memory_space<vmem>>, vector<1x32xf32>
    %c32_2 = arith.constant 32 : index
    %c32_3 = arith.constant 32 : index
    %2 = vector.load %arg1[%c32_2, %c32_3] : memref<40x96xf32, #tpu.memory_space<vmem>>, vector<1x32xf32>
    %c32_4 = arith.constant 32 : index
    %c64 = arith.constant 64 : index
    %3 = vector.load %arg1[%c32_4, %c64] : memref<40x96xf32, #tpu.memory_space<vmem>>, vector<1x32xf32>
    %c33 = arith.constant 33 : index
    %c0_5 = arith.constant 0 : index
    %4 = vector.load %arg1[%c33, %c0_5] : memref<40x96xf32, #tpu.memory_space<vmem>>, vector<1x32xf32>
    %c0_6 = arith.constant 0 : index
    %c0_7 = arith.constant 0 : index
    %5 = vector.load %arg0[%c0_6, %c0_7] : memref<48x32xf32, #tpu.memory_space<vmem>>, vector<48x32xf32>
    %cst = arith.constant dense<0.000000e+00> : vector<48x96xf32>
    %6 = tpu.matmul %5, %0, %cst {dimension_numbers = #tpu.dot_dimension_numbers<[1], [0], [0], [1], [0, 0, 1, 1], [], []>} : vector<48x32xf32>, vector<32x96xf32>, vector<48x96xf32> -> vector<48x96xf32>
    %7 = vector.extract_strided_slice %6 {offsets = [0, 0], sizes = [16, 32], strides = [1, 1]} : vector<48x96xf32> to vector<16x32xf32>
    %8 = vector.broadcast %1 : vector<1x32xf32> to vector<16x32xf32>
    %9 = arith.addf %7, %8 : vector<16x32xf32>
    %10 = vector.extract_strided_slice %6 {offsets = [16, 32], sizes = [32, 32], strides = [1, 1]} : vector<48x96xf32> to vector<32x32xf32>
    %11 = vector.extract_strided_slice %6 {offsets = [16, 64], sizes = [32, 32], strides = [1, 1]} : vector<48x96xf32> to vector<32x32xf32>
    %cst_8 = arith.constant dense<0xFF800000> : vector<16xf32>
    %12 = vector.multi_reduction <maximumf>, %9, %cst_8 [1] : vector<16x32xf32> to vector<16xf32>
    %13 = vector.shape_cast %12 : vector<16xf32> to vector<16x1xf32>
    %14 = vector.broadcast %13 : vector<16x1xf32> to vector<16x32xf32>
    %15 = arith.subf %9, %14 : vector<16x32xf32>
    %16 = math.exp %15 : vector<16x32xf32>
    %cst_9 = arith.constant dense<0.000000e+00> : vector<16xf32>
    %17 = vector.multi_reduction <add>, %16, %cst_9 [1] : vector<16x32xf32> to vector<16xf32>
    %18 = vector.shape_cast %17 : vector<16xf32> to vector<16x1xf32>
    %cst_10 = arith.constant dense<0xFF800000> : vector<32xf32>
    %19 = vector.multi_reduction <maximumf>, %10, %cst_10 [0] : vector<32x32xf32> to vector<32xf32>
    %20 = vector.shape_cast %19 : vector<32xf32> to vector<1x32xf32>
    %21 = vector.broadcast %20 : vector<1x32xf32> to vector<32x32xf32>
    %22 = arith.subf %10, %21 : vector<32x32xf32>
    %23 = math.exp %22 : vector<32x32xf32>
    %cst_11 = arith.constant dense<0.000000e+00> : vector<32xf32>
    %24 = vector.multi_reduction <add>, %23, %cst_11 [0] : vector<32x32xf32> to vector<32xf32>
    %25 = vector.shape_cast %24 : vector<32xf32> to vector<1x32xf32>
    %26 = tpu.reciprocal %25 : vector<1x32xf32> -> vector<1x32xf32>
    %27 = vector.broadcast %26 : vector<1x32xf32> to vector<32x32xf32>
    %28 = arith.mulf %23, %27 : vector<32x32xf32>
    %29 = arith.mulf %28, %11 : vector<32x32xf32>
    %cst_12 = arith.constant dense<0.000000e+00> : vector<32xf32>
    %30 = vector.multi_reduction <add>, %29, %cst_12 [0] : vector<32x32xf32> to vector<32xf32>
    %31 = vector.shape_cast %30 : vector<32xf32> to vector<1x32xf32>
    %32 = arith.addf %31, %2 : vector<1x32xf32>
    %33 = vector.broadcast %32 : vector<1x32xf32> to vector<16x32xf32>
    %34 = arith.mulf %16, %33 : vector<16x32xf32>
    %cst_13 = arith.constant dense<0.000000e+00> : vector<16xf32>
    %35 = vector.multi_reduction <add>, %34, %cst_13 [1] : vector<16x32xf32> to vector<16xf32>
    %36 = vector.shape_cast %35 : vector<16xf32> to vector<16x1xf32>
    %cst_14 = arith.constant 3.200000e+01 : f32
    %37 = vector.broadcast %cst_14 : f32 to vector<16x1xf32>
    %38 = arith.divf %36, %37 : vector<16x1xf32>
    %39 = vector.broadcast %38 : vector<16x1xf32> to vector<16x32xf32>
    %40 = arith.subf %34, %39 : vector<16x32xf32>
    %41 = arith.mulf %40, %40 : vector<16x32xf32>
    %cst_15 = arith.constant dense<0.000000e+00> : vector<16xf32>
    %42 = vector.multi_reduction <add>, %41, %cst_15 [1] : vector<16x32xf32> to vector<16xf32>
    %43 = vector.shape_cast %42 : vector<16xf32> to vector<16x1xf32>
    %cst_16 = arith.constant 3.200000e+01 : f32
    %44 = vector.broadcast %cst_16 : f32 to vector<16x1xf32>
    %45 = arith.divf %43, %44 : vector<16x1xf32>
    %46 = arith.mulf %18, %18 : vector<16x1xf32>
    %cst_17 = arith.constant 9.99999974E-6 : f32
    %47 = vector.broadcast %cst_17 : f32 to vector<16x1xf32>
    %48 = arith.mulf %47, %46 : vector<16x1xf32>
    %49 = arith.addf %45, %48 : vector<16x1xf32>
    %50 = math.rsqrt %49 : vector<16x1xf32>
    %51 = vector.broadcast %50 : vector<16x1xf32> to vector<16x32xf32>
    %52 = arith.mulf %40, %51 : vector<16x32xf32>
    %53 = vector.broadcast %3 : vector<1x32xf32> to vector<16x32xf32>
    %54 = arith.mulf %52, %53 : vector<16x32xf32>
    %55 = vector.broadcast %4 : vector<1x32xf32> to vector<16x32xf32>
    %56 = arith.addf %54, %55 : vector<16x32xf32>
    %c0_18 = arith.constant 0 : index
    %c0_19 = arith.constant 0 : index
    %57 = vector.load %arg2[%c0_18, %c0_19] : memref<16x32xf32, #tpu.memory_space<vmem>>, vector<16x32xf32>
    tpu.vector_store %arg2[%c0_18, %c0_19], %56 {strides = array<i32>} : memref<16x32xf32, #tpu.memory_space<vmem>>, vector<16x32xf32>,
    return
  }
}

</mosaic_0001>

<bundles_post_ra>
// kernel: tpu_custom_call.1
= control target key start
LH: loop header
LB: loop body
LE: loop exit
PB: predicated region body
PF: predicated region fallthrough
CT: control target
= control target key end

     0   :  { %vm24_vm0 = vcmask 261120   ;;  %s506_s0 = inlined_call_operand.vmem [shape: f32[48,32], index: 0, kind: input, shape index: {}]   ;;  %s507_s1 = inlined_call_operand.vmem [shape: f32[40,96], index: 1, kind: input, shape index: {}]   ;;  %s508_s2 = inlined_call_operand.hbm [shape: f32[16,32], index: 2, kind: output, shape index: {}]  }
   0x1   :  { %v15_v0 = vld [vmem:[%s507_s1 + $0x18] sm:$0xff]  ;;  %v14_v1 = vld [vmem:[%s507_s1 + $0x10] sm:$0xff]  ;;  %v13_v3 = vld [vmem:[%s507_s1 + $0x8] sm:$0xff] }
   0x2   :  { %345 = vmatprep.subr.mxu1 %v15_v0  ;;  %v20_v2 = vld [vmem:[%s506_s0 + $0x10] sm:$0xff]  ;;  %328 = vmatprep.subr.mxu0 %v15_v0 }
   0x3   :  { %349 = vmatpush3.msra.mxu1 %v15_v0  ;;  %339 = vmatprep.mubr.msk.f32.mxu1 %vm24_vm0, %v20_v2 }
   0x4   :  { %346 = vmatprep.subr.mxu1 %v14_v1  ;;  %329 = vmatpush3.msra.mxu0 %v15_v0 }
   0x5   :  { %7 = vsyncpa [#allocation3], 0  ;;  %350 = vmatpush3.msra.mxu1 %v14_v1  ;;  %v12_v4 = vld [vmem:[%s507_s1] sm:$0xff]  ;;  %330 = vmatprep.subr.mxu0 %v14_v1  ;;  %v21_v5 = vld [vmem:[%s506_s0 + $0x18] sm:$0xff]  ;;  %s398_s29 = smov 96   ;;  %vm162_vm1 = vcmask 523520   ;;  %v138_v23 = vlaneseq }
   0x6   :  { %347 = vmatprep.subr.mxu1 %v13_v3  ;;  %331 = vmatpush3.msra.mxu0 %v14_v1  ;;  %v22_v6 = vld [vmem:[%s506_s0 + $0x20] sm:$0xff]  ;;  %v19_v8 = vld [vmem:[%s506_s0 + $0x8] sm:$0xff]  ;;  %s399_s3 = smov 64   ;;  %s400_s6 = smov [#allocation2]  }
   0x7   :  { %351 = vmatpush3.msra.mxu1 %v13_v3  ;;  %332 = vmatprep.subr.mxu0 %v13_v3  ;;  %v18_v7 = vld [vmem:[%s506_s0] sm:$0xff]  ;;  %v23_v9 = vld [vmem:[%s506_s0 + $0x28] sm:$0xff]  ;;  %v462_v26 = vshrl.u32 %v138_v23, 7  ;;  %s300_s7 = sshll.u32 %s400_s6, 4  ;;  %s301_s7 = int_to_ptr.vmem [resolvable:$true] %s300_s7 }
   0x8   :  { %348 = vmatprep.subr.mxu1 %v12_v4  ;;  %333 = vmatpush3.msra.mxu0 %v13_v3  ;;  %v468_v32 = vld [vmem:[%s507_s1 + $0x20] sm:$0x1]  ;;  %s376_s8 = scalar_lea.vmem %s301_s7, 256  ;;  %p381_p1 = scmp.lt.s32.totalorder %s301_s7, %s301_s7 }
   0x9   :  { %352 = vmatpush3.msra.mxu1 %v12_v4  ;;  %334 = vmatprep.subr.mxu0 %v12_v4  ;;  %v140_v29 = vsub.s32 0, %v462_v26  ;;  %p377_p0 = scmp.ne.s32.totalorder %s301_s7, %s376_s8  ;;  %p382_p2 = scmp.lt.s32.totalorder %s376_s8, %s376_s8 }
   0xa   :  { %340 = vmatmul.mubr.msk.f32.vlgmr.msra.gmra.mxu1 %vm24_vm0, %v21_v5  ;;  %335 = vmatpush3.msra.mxu0 %v12_v4 }
   0xb   :  { %342 = vmatprep.mubr.msk.f32.mxu1 %vm24_vm0, %v22_v6  ;;  %336 = vmatprep.mubr.msk.f32.mxu0 %vm24_vm0, %v18_v7  ;;  %v473_v38 = vrot.slane %v468_v32, %v140_v29  ;;  %p383_p3 = por %p382_p2, %p381_p1 }
   0xc   :  { %337 = vmatmul.mubr.msk.f32.vlgmr.msra.gmra.mxu0 %vm24_vm0, %v19_v8 }
   0xd   :  { %p384_p4 = pnand %p383_p3, %p377_p0 }
   0xe   :  { %343 = vmatmul.mubr.msk.f32.gmra.mxu1 %vm24_vm0, %v23_v9 }
  0xca   :  { %v341_v10 = vpop.f32.mrf.mxu1 }
  0xcb   :  { %v164_v15 = vsel %vm162_vm1, %v341_v10, -inf }
  0xcc   :  { %v119_v11 = vpop.f32.mrf.mxu1  ;;  %v338_v33 = vpop.f32.mrf.mxu0 }
  0xcd   :  { %210 = vrot.lane.b32.xlu0 %v119_v11, %s398_s29  ;;  %v163_v13 = vsel %vm162_vm1, %v119_v11, -inf  ;;  %v143_v44 = vadd.f32 %v338_v33, %v473_v38 }
  0xce   :  { %v344_v12 = vpop.f32.mrf.mxu1  ;;  %v167_v18 = vmax.f32 %v163_v13, %v164_v15  ;;  %v109_v40 = vpop.f32.mrf.mxu0 }
  0xcf   :  { %v166_v16 = vsel %vm162_vm1, %v344_v12, -inf  ;;  %v142_v42 = vadd.f32 %v473_v38, %v109_v40  ;;  %v147_v49 = vsel %vm24_vm0, %v143_v44, -inf }
  0xd0   :  { %v129_v14 = vpop.f32.mrf.mxu1 }
  0xd1   :  { %v165_v17 = vsel %vm162_vm1, %v129_v14, -inf  ;;  %212 = vrot.lane.b32.xlu0 %v341_v10, %s398_s29  ;;  %214 = vrot.lane.b32.xlu1 %v129_v14, %s398_s29  ;;  %v144_v43 = vsel %vm24_vm0, %v142_v42, -inf }
  0xd2   :  { %v168_v19 = vmax.f32 %v165_v17, %v166_v16 }
  0xd4   :  { %v169_v20 = vmax.f32 %v167_v18, %v168_v19 }
  0xd5   :  { %216 = vrot.lane.b32.xlu1 %v344_v12, %s398_s29 }
  0xd6   :  { %v170_v21 = vrot.slane %v169_v20, 4 }
  0xd8   :  { %v171_v22 = vmax.f32 %v169_v20, %v170_v21 }
  0xda   :  { %v172_v24 = vrot.slane %v171_v22, 2 }
  0xdc   :  { %v173_v25 = vmax.f32 %v171_v22, %v172_v24 }
  0xde   :  { %v174_v27 = vrot.slane %v173_v25, 1 }
  0xe0   :  { %v175_v28 = vmax.f32 %v173_v25, %v174_v27 }
  0xe2   :  { %v177_v30 = vsub.f32 %v341_v10, %v175_v28  ;;  %v178_v31 = vsub.f32 %v129_v14, %v175_v28  ;;  %v176_v34 = vsub.f32 %v119_v11, %v175_v28  ;;  %v179_v35 = vsub.f32 %v344_v12, %v175_v28 }
  0xe4   :  { %v182_v36 = vmul.f32 1.442695, %v177_v30  ;;  %v184_v37 = vmul.f32 1.442695, %v178_v31  ;;  %v180_v39 = vmul.f32 1.442695, %v176_v34 }
  0xe5   :  { %v186_v41 = vmul.f32 1.442695, %v179_v35 }
  0xe6   :  { %358 = vpow2.f32 %v182_v36 }
  0xe7   :  { %360 = vpow2.f32 %v184_v37 }
  0xe8   :  { %362 = vpow2.f32 %v180_v39 }
  0xe9   :  { %364 = vpow2.f32 %v186_v41 }
  0xf0   :  { %145 = vmax.xlane.f32.xlu0 %v144_v43 }
  0xf3   :  { %v359_v45 = vpop.eup %358 }
  0xf4   :  { %v361_v46 = vpop.eup %360  ;;  %v189_v47 = vsel %vm162_vm1, %v359_v45, 0.0 }
  0xf5   :  { %v363_v48 = vpop.eup %362  ;;  %v191_v53 = vsel %vm162_vm1, %v361_v46, 0.0 }
  0xf6   :  { %v188_v50 = vsel %vm162_vm1, %v363_v48, 0.0  ;;  %v365_v51 = vpop.eup %364 }
  0xf7   :  { %v190_v52 = vadd.f32 %v189_v47, %v188_v50  ;;  %v193_v55 = vsel %vm162_vm1, %v365_v51, 0.0 }
  0xf9   :  { %148 = vmax.xlane.f32.xlu1 %v147_v49  ;;  %v192_v54 = vadd.f32 %v191_v53, %v190_v52 }
  0xfb   :  { %v194_v56 = vadd.f32 %v193_v55, %v192_v54 }
  0xfd   :  { %v195_v57 = vrot.slane %v194_v56, 4 }
  0xff   :  { %v196_v58 = vadd.f32 %v195_v57, %v194_v56 }
 0x101   :  { %v197_v59 = vrot.slane %v196_v58, 2 }
 0x103   :  { %v198_v60 = vadd.f32 %v197_v59, %v196_v58 }
 0x105   :  { %v199_v61 = vrot.slane %v198_v60, 1 }
 0x107   :  { %v200_v62 = vadd.f32 %v199_v61, %v198_v60 }
 0x109   :  { %366 = vrcp.f32 %v200_v62 }
 0x116   :  { %v367_v63 = vpop.eup %366 }
 0x117   :  { %v202_v0 = vmul.f32 %v367_v63, %v363_v48  ;;  %v203_v1 = vmul.f32 %v367_v63, %v359_v45  ;;  %v204_v2 = vmul.f32 %v367_v63, %v361_v46  ;;  %v205_v3 = vmul.f32 %v367_v63, %v365_v51 }
 0x13f   :  { %v211_v4 = vpop.permute.xlu0 %210 }
 0x140   :  { %v222_v5 = vmul.f32 %v211_v4, %v202_v0 }
 0x142   :  { %v226_v10 = vsel %vm162_vm1, %v222_v5, 0.0 }
 0x143   :  { %v213_v6 = vpop.permute.xlu0 %212  ;;  %v215_v7 = vpop.permute.xlu1 %214 }
 0x144   :  { %v223_v8 = vmul.f32 %v213_v6, %v203_v1  ;;  %v224_v9 = vmul.f32 %v215_v7, %v204_v2 }
 0x146   :  { %v227_v11 = vsel %vm162_vm1, %v223_v8, 0.0  ;;  %v229_v14 = vsel %vm162_vm1, %v224_v9, 0.0 }
 0x147   :  { %v228_v12 = vadd.f32 %v227_v11, %v226_v10  ;;  %v217_v13 = vpop.permute.xlu1 %216 }
 0x148   :  { %v225_v15 = vmul.f32 %v217_v13, %v205_v3 }
 0x149   :  { %v230_v16 = vadd.f32 %v229_v14, %v228_v12 }
 0x14a   :  { %v231_v17 = vsel %vm162_vm1, %v225_v15, 0.0 }
 0x14b   :  { %v232_v18 = vadd.f32 %v231_v17, %v230_v16 }
 0x14d   :  { %v233_v19 = vrot.slane %v232_v18, 4 }
 0x14f   :  { %v234_v20 = vadd.f32 %v233_v19, %v232_v18 }
 0x151   :  { %v235_v21 = vrot.slane %v234_v20, 2 }
 0x153   :  { %v236_v22 = vadd.f32 %v235_v21, %v234_v20 }
 0x155   :  { %v237_v23 = vrot.slane %v236_v22, 1 }
 0x157   :  { %v238_v24 = vadd.f32 %v237_v23, %v236_v22 }
 0x159   :  { %v239_v25 = vadd.f32 %v238_v24, %v468_v32 }
 0x15b   :  { %v243_v27 = vrot.slane %v239_v25, %v140_v29 }
 0x15d   :  { %245 = vrot.lane.b32.xlu0 %v243_v27, %s398_s29 }
 0x179   :  { %v146_v28 = vpop.xlane.xlu0 %145 }
 0x17a   :  { %v150_v31 = vsub.f32 %v142_v42, %v146_v28 }
 0x17c   :  { %v152_v34 = vmul.f32 1.442695, %v150_v31 }
 0x17e   :  { %368 = vpow2.f32 %v152_v34 }
 0x182   :  { %v149_v30 = vpop.xlane.xlu1 %148 }
 0x183   :  { %v151_v33 = vsub.f32 %v143_v44, %v149_v30 }
 0x185   :  { %v154_v35 = vmul.f32 1.442695, %v151_v33 }
 0x187   :  { %370 = vpow2.f32 %v154_v35 }
 0x18b   :  { %v369_v36 = vpop.eup %368 }
 0x18c   :  { %v156_v29 = vsel %vm24_vm0, %v369_v36, 0.0 }
 0x194   :  { %v371_v40 = vpop.eup %370 }
 0x195   :  { %v159_v42 = vsel %vm24_vm0, %v371_v40, 0.0 }
 0x1cf   :  { %v246_v37 = vpop.permute.xlu0 %245 }
 0x1d0   :  { %v248_v39 = vmul.f32 %v369_v36, %v246_v37  ;;  %v249_v41 = vmul.f32 %v371_v40, %v246_v37 }
 0x1d2   :  { %v250_v32 = vsel %vm24_vm0, %v248_v39, 0.0  ;;  %v253_v26 = vsel %vm24_vm0, %v249_v41, 0.0 }
 0x1d3   :  { %251 = vadd.xlane.f32.xlu1 %v250_v32 }
 0x1d7   :  { %254 = vadd.xlane.f32.xlu1 %v253_v26 }
 0x1db   :  { %157 = vadd.xlane.f32.xlu1 %v156_v29 }
 0x1df   :  { %160 = vadd.xlane.f32.xlu1 %v159_v42 }
 0x25c   :  { %v252_v43 = vpop.xlane.xlu1 %251 }
 0x25d   :  { %v257_v44 = vmul.f32 0.03125, %v252_v43 }
 0x25f   :  { %v259_v45 = vsub.f32 %v248_v39, %v257_v44 }
 0x260   :  { %v255_v46 = vpop.xlane.xlu1 %254 }
 0x261   :  { %v258_v47 = vmul.f32 0.03125, %v255_v46  ;;  %v261_v48 = vmul.f32 %v259_v45, %v259_v45 }
 0x263   :  { %v260_v49 = vsub.f32 %v249_v41, %v258_v47  ;;  %v263_v50 = vsel %vm24_vm0, %v261_v48, 0.0 }
 0x264   :  { %264 = vadd.xlane.f32.xlu1 %v263_v50  ;;  %v158_v53 = vpop.xlane.xlu1 %157 }
 0x265   :  { %v262_v51 = vmul.f32 %v260_v49, %v260_v49  ;;  %v271_v55 = vmul.f32 %v158_v53, %v158_v53 }
 0x267   :  { %v266_v52 = vsel %vm24_vm0, %v262_v51, 0.0  ;;  %v273_v57 = vmul.f32 1e-05, %v271_v55 }
 0x268   :  { %267 = vadd.xlane.f32.xlu0 %v266_v52  ;;  %v161_v54 = vpop.xlane.xlu1 %160 }
 0x269   :  { %v272_v58 = vmul.f32 %v161_v54, %v161_v54 }
 0x26b   :  { %v274_v62 = vmul.f32 1e-05, %v272_v58 }
 0x275   :  { %282 = vrot.lane.b32.xlu1 %v473_v38, %s399_s3  ;;  %v317_v38 = vld [vmem:[%s507_s1 + $0x21] ss:$0 sm:$0xff] }
 0x2ed   :  { %v265_v56 = vpop.xlane.xlu1 %264 }
 0x2ee   :  { %v269_v59 = vmul.f32 0.03125, %v265_v56 }
 0x2f0   :  { %v275_v60 = vadd.f32 %v273_v57, %v269_v59 }
 0x2f1   :  { %v268_v61 = vpop.xlane.xlu0 %267  ;;  %v283_v2 = vpop.permute.xlu1 %282 }
 0x2f2   :  { %372 = vrsqrt.f32 %v275_v60  ;;  %v270_v63 = vmul.f32 0.03125, %v268_v61 }
 0x2f4   :  { %v276_v0 = vadd.f32 %v274_v62, %v270_v63 }
 0x2f6   :  { %374 = vrsqrt.f32 %v276_v0 }
 0x2ff   :  { %v373_v1 = vpop.eup %372 }
 0x300   :  { %v279_v3 = vmul.f32 %v373_v1, %v259_v45 }
 0x302   :  { %v285_v4 = vmul.f32 %v283_v2, %v279_v3 }
 0x303   :  { %v375_v5 = vpop.eup %374 }
 0x304   :  { %v280_v6 = vmul.f32 %v375_v5, %v260_v49  ;;  %v291_v7 = vadd.f32 %v317_v38, %v285_v4 }
 0x306   :  { %v286_v8 = vmul.f32 %v283_v2, %v280_v6  ;;  %293 = vst.msk [vmem:[#allocation2] sm:$0xff] %vm24_vm0, %v291_v7 }
 0x308   :  { %v292_v9 = vadd.f32 %v317_v38, %v286_v8 }
 0x30a   :  { %294 = vst.msk [vmem:[#allocation2 + $0x8] sm:$0xff] %vm24_vm0, %v292_v9 }
 0x30b   :  { %387 = shalt.err (!%p384_p4)
}
 0x30c   :  { %s401_s1 = smov 128   ;;  %s402_s9 = smov 8  }
 0x30d   :  { %306 = dma.vmem_to_hbm [thread:$0]  %s301_s7, 256, %s508_s2, [#allocation3], %s401_s1, %s401_s1, %s402_s9  }
 0x30e   :  { %396 = dma.done.wait [#allocation3], 256  }
 0x30f   :  { %397 = vsyncadd [#allocation3], 4294967040 }
 0x310   :  { %310 = vsyncpa [#allocation3], 1 }

</bundles_post_ra>
